<compile_context>
chip_gen: v7x
topology: tpu7x:2x2x1
jax: 0.10.0
libtpu: 0.0.40
codegen_flags: <defaults>
</compile_context>

<pallas_src>
import jax
import jax.numpy as jnp
from jax.experimental import pallas as pl
from jax.experimental.pallas import tpu as pltpu


def _bmm_accumulate_into_out_kernel(x_ref, w_ref, o_ref):
    """f32 output: the resident output block doubles as the accumulator."""
    @pl.when(pl.program_id(3) == 0)
    def _init():
        o_ref[...] = jnp.zeros_like(o_ref)

    o_ref[...] += jnp.dot(x_ref[...], w_ref[...],
                          preferred_element_type=jnp.float32)


def _bmm_scratch_acc_kernel(x_ref, w_ref, o_ref, acc_ref):
    """Low-precision output: f32 VMEM accumulator, cast + store at k == last."""
    @pl.when(pl.program_id(3) == 0)
    def _init():
        acc_ref[...] = jnp.zeros_like(acc_ref)

    acc_ref[...] += jnp.dot(x_ref[...], w_ref[...],
                            preferred_element_type=jnp.float32)

    @pl.when(pl.program_id(3) == pl.num_programs(3) - 1)
    def _store():
        o_ref[...] = acc_ref[...].astype(o_ref.dtype)


def _round_up(x, m):
    return (x + m - 1) // m * m


def _pick_tile(dim, cap):
    """Balanced tile size: a multiple of 128, <= cap, covering `dim` in the
    minimum number of blocks a cap-sized tile would need."""
    dim128 = _round_up(dim, 128)
    nblk = -(-dim128 // cap)
    return _round_up(-(-dim128 // nblk), 128)


def batch_projection(x, weight, *, tm=512, tn=512, tk=1024,
                     compute_dtype=jnp.bfloat16):
    """Forward of BatchProjection: torch.bmm(x, weight).

    x      : [B, M, K]
    weight : [B, K, N]
    returns: [B, M, N] in x's dtype.

    compute_dtype: dtype fed to the MXU (accumulation is always f32). Defaults
    to bfloat16 for throughput; pass jnp.float32 for exact f32 numerics, or
    None to use the input dtypes unchanged.
    """
    B, M, K = x.shape
    Bw, Kw, N = weight.shape
    assert B == Bw and K == Kw, "batch / contraction dims must match"
    out_dtype = x.dtype

    if compute_dtype is not None:
        compute_dtype = jnp.dtype(compute_dtype)
        if x.dtype != compute_dtype:
            x = x.astype(compute_dtype)
        if weight.dtype != compute_dtype:
            weight = weight.astype(compute_dtype)

    # Tile selection: multiples of 128, capped, balanced across blocks so small
    # problems collapse to a near-minimal grid.
    tm = _pick_tile(M, tm)
    tn = _pick_tile(N, tn)
    tk = _pick_tile(K, tk)

    # Only the contraction axis needs zero padding: garbage read by partial
    # M/N edge blocks never reaches a valid output element (OOB stores are
    # dropped), but garbage on K would corrupt the reduction.
    Kp = _round_up(K, tk)
    if Kp != K:
        x = jnp.pad(x, ((0, 0), (0, 0), (0, Kp - K)))
        weight = jnp.pad(weight, ((0, 0), (0, Kp - K), (0, 0)))

    grid = (B, pl.cdiv(M, tm), pl.cdiv(N, tn), Kp // tk)

    accumulate_into_out = jnp.dtype(out_dtype) == jnp.dtype(jnp.float32)
    if accumulate_into_out:
        kernel = _bmm_accumulate_into_out_kernel
        scratch_shapes = []
    else:
        kernel = _bmm_scratch_acc_kernel
        scratch_shapes = [pltpu.VMEM((tm, tn), jnp.float32)]

    itemsize_c = jnp.dtype(x.dtype).itemsize
    itemsize_o = jnp.dtype(out_dtype).itemsize

    # Double-buffered input/output tiles (+ optional scratch) + slack, capped
    # under v7x's 64 MiB physical VMEM.
    footprint = (2 * (tm * tk + tk * tn) * itemsize_c
                 + 2 * tm * tn * itemsize_o)
    if not accumulate_into_out:
        footprint += tm * tn * 4
    vmem_limit = int(min(48 * 1024 * 1024,
                         max(32 * 1024 * 1024, footprint + (8 << 20))))

    cost = pl.CostEstimate(
        flops=2 * B * M * Kp * N,
        transcendentals=0,
        bytes_accessed=(B * M * Kp + B * Kp * N) * itemsize_c
        + B * M * N * itemsize_o,
    )

    out = pl.pallas_call(
        kernel,
        out_shape=jax.ShapeDtypeStruct((B, M, N), out_dtype),
        grid_spec=pltpu.PrefetchScalarGridSpec(
            num_scalar_prefetch=0,
            grid=grid,
            in_specs=[
                pl.BlockSpec((pl.Squeezed(), tm, tk),
                             lambda b, i, j, k: (b, i, k)),
                pl.BlockSpec((pl.Squeezed(), tk, tn),
                             lambda b, i, j, k: (b, k, j)),
            ],
            out_specs=pl.BlockSpec((pl.Squeezed(), tm, tn),
                                   lambda b, i, j, k: (b, i, j)),
            scratch_shapes=scratch_shapes,
        ),
        compiler_params=pltpu.CompilerParams(
            dimension_semantics=("parallel", "parallel", "parallel", "arbitrary"),
            vmem_limit_bytes=vmem_limit,
        ),
        cost_estimate=cost,
    )(x, weight)
    return out
    # TODO(synk): the reference forward's .as_subclass(vsa_tensor) is a Python
    # type tag (MAP/HRR/VTB VSA tensor subclass) with no numerical effect; it
    # has no Pallas equivalent and is intentionally omitted.


if __name__ == "__main__":
    key = jax.random.PRNGKey(0)
    k_x, k_w, k_x2, k_w2 = jax.random.split(key, 4)

    # ---- Small shapes consistent with BatchProjection's bmm forward --------
    num_projections, seq, in_features, out_features = 2, 256, 256, 128

    x = jax.random.normal(k_x, (num_projections, seq, in_features), jnp.float32)

    # reset_parameters(): normal(0, 1) followed by F.normalize (L2 over dim=1).
    w = jax.random.normal(
        k_w, (num_projections, in_features, out_features), jnp.float32)
    w = w / jnp.maximum(jnp.sqrt(jnp.sum(w * w, axis=1, keepdims=True)), 1e-12)

    ref = jnp.einsum("bmk,bkn->bmn", x, w,
                     precision=jax.lax.Precision.HIGHEST)

    # 1) Default fast path: bf16 MXU operands, f32 accumulation.
    out = batch_projection(x, w)
    jax.block_until_ready(out)
    assert out.shape == (num_projections, seq, out_features)
    assert out.dtype == x.dtype
    err_bf16 = float(jnp.max(jnp.abs(out - ref)))
    assert err_bf16 < 1e-1, f"bf16-compute max abs error {err_bf16}"

    # 2) Exact f32 opt-in path (matches torch.bmm f32 numerics).
    out_f32 = batch_projection(x, w, compute_dtype=jnp.float32)
    jax.block_until_ready(out_f32)
    err_f32 = float(jnp.max(jnp.abs(out_f32 - ref)))
    assert err_f32 < 1e-2, f"f32-compute max abs error {err_f32}"

    # 3) Ragged dims (partial M/N edge tiles, zero-padded K) with bf16 in/out,
    #    exercising the scratch-accumulator kernel variant.
    B2, M2, K2, N2 = 3, 200, 200, 96
    x2 = jax.random.normal(k_x2, (B2, M2, K2), jnp.bfloat16)
    w2 = jax.random.normal(k_w2, (B2, K2, N2), jnp.float32)
    w2 = w2 / jnp.maximum(jnp.sqrt(jnp.sum(w2 * w2, axis=1, keepdims=True)), 1e-12)
    w2 = w2.astype(jnp.bfloat16)

    out2 = batch_projection(x2, w2)
    jax.block_until_ready(out2)
    assert out2.shape == (B2, M2, N2)
    ref2 = jnp.einsum("bmk,bkn->bmn",
                      x2.astype(jnp.float32), w2.astype(jnp.float32),
                      precision=jax.lax.Precision.HIGHEST)
    err2 = float(jnp.max(jnp.abs(out2.astype(jnp.float32) - ref2)))
    assert err2 < 1e-1, f"ragged/bf16 max abs error {err2}"

    print("KERNEL_OK")
</pallas_src>

<mosaic_0001>
module attributes {stable_mosaic.version = 11 : i64} {
  func.func @_bmm_accumulate_into_out_kernel(%arg0: i32, %arg1: i32, %arg2: i32, %arg3: i32, %arg4: memref<1x256x256xbf16, #tpu.memory_space<vmem>>, %arg5: memref<1x256x128xbf16, #tpu.memory_space<vmem>>, %arg6: memref<1x256x128xf32, #tpu.memory_space<vmem>>) attributes {dimension_semantics = [#tpu.dimension_semantics<parallel>, #tpu.dimension_semantics<parallel>, #tpu.dimension_semantics<parallel>, #tpu.dimension_semantics<arbitrary>], iteration_bounds = array<i64: 2, 1, 1, 1>, scalar_prefetch = 0 : i64, scratch_operands = 0 : i64, tpu.core_type = #tpu.core_type<tc>, window_params = [{transform_indices = @transform_0, window_bounds = array<i64: 1, 256, 256>}, {transform_indices = @transform_1, window_bounds = array<i64: 1, 256, 128>}, {transform_indices = @transform_2, window_bounds = array<i64: 1, 256, 128>}]} {
    %c0_i32 = arith.constant 0 : i32
    %0 = arith.cmpi eq, %arg3, %c0_i32 : i32
    %1 = arith.extui %0 : i1 to i32
    %c0_i32_0 = arith.constant 0 : i32
    %2 = arith.cmpi ne, %1, %c0_i32_0 : i32
    scf.if %2 {
      %cst_12 = arith.constant 0.000000e+00 : f32
      %14 = vector.broadcast %cst_12 : f32 to vector<256x128xf32>
      %c0_13 = arith.constant 0 : index
      %c0_14 = arith.constant 0 : index
      %c0_15 = arith.constant 0 : index
      %15 = vector.load %arg6[%c0_13, %c0_14, %c0_15] : memref<1x256x128xf32, #tpu.memory_space<vmem>>, vector<1x256x128xf32>
      %16 = vector.shape_cast %15 : vector<1x256x128xf32> to vector<256x128xf32>
      %17 = vector.shape_cast %14 : vector<256x128xf32> to vector<1x256x128xf32>
      tpu.vector_store %arg6[%c0_13, %c0_14, %c0_15], %17 {strides = array<i32>} : memref<1x256x128xf32, #tpu.memory_space<vmem>>, vector<1x256x128xf32>,
    } else {
    }
    %c0 = arith.constant 0 : index
    %c0_1 = arith.constant 0 : index
    %c0_2 = arith.constant 0 : index
    %3 = vector.load %arg6[%c0, %c0_1, %c0_2] : memref<1x256x128xf32, #tpu.memory_space<vmem>>, vector<1x256x128xf32>
    %4 = vector.shape_cast %3 : vector<1x256x128xf32> to vector<256x128xf32>
    %c0_3 = arith.constant 0 : index
    %c0_4 = arith.constant 0 : index
    %c0_5 = arith.constant 0 : index
    %5 = vector.load %arg4[%c0_3, %c0_4, %c0_5] : memref<1x256x256xbf16, #tpu.memory_space<vmem>>, vector<1x256x256xbf16>
    %6 = vector.shape_cast %5 : vector<1x256x256xbf16> to vector<256x256xbf16>
    %c0_6 = arith.constant 0 : index
    %c0_7 = arith.constant 0 : index
    %c0_8 = arith.constant 0 : index
    %7 = vector.load %arg5[%c0_6, %c0_7, %c0_8] : memref<1x256x128xbf16, #tpu.memory_space<vmem>>, vector<1x256x128xbf16>
    %8 = vector.shape_cast %7 : vector<1x256x128xbf16> to vector<256x128xbf16>
    %cst = arith.constant dense<0.000000e+00> : vector<256x128xf32>
    %9 = tpu.matmul %6, %8, %cst {dimension_numbers = #tpu.dot_dimension_numbers<[1], [0], [0], [1], [0, 0, 1, 1], [], []>} : vector<256x256xbf16>, vector<256x128xbf16>, vector<256x128xf32> -> vector<256x128xf32>
    %10 = arith.addf %4, %9 : vector<256x128xf32>
    %c0_9 = arith.constant 0 : index
    %c0_10 = arith.constant 0 : index
    %c0_11 = arith.constant 0 : index
    %11 = vector.load %arg6[%c0_9, %c0_10, %c0_11] : memref<1x256x128xf32, #tpu.memory_space<vmem>>, vector<1x256x128xf32>
    %12 = vector.shape_cast %11 : vector<1x256x128xf32> to vector<256x128xf32>
    %13 = vector.shape_cast %10 : vector<256x128xf32> to vector<1x256x128xf32>
    tpu.vector_store %arg6[%c0_9, %c0_10, %c0_11], %13 {strides = array<i32>} : memref<1x256x128xf32, #tpu.memory_space<vmem>>, vector<1x256x128xf32>,
    return
  }
  func.func @transform_0(%arg0: i32, %arg1: i32, %arg2: i32, %arg3: i32) -> (i32, i32, i32) {
    %c0_i32 = arith.constant 0 : i32
    return %arg0, %arg1, %arg3 : i32, i32, i32
  }
  func.func @transform_1(%arg0: i32, %arg1: i32, %arg2: i32, %arg3: i32) -> (i32, i32, i32) {
    %c0_i32 = arith.constant 0 : i32
    return %arg0, %arg3, %arg2 : i32, i32, i32
  }
  func.func @transform_2(%arg0: i32, %arg1: i32, %arg2: i32, %arg3: i32) -> (i32, i32, i32) {
    %c0_i32 = arith.constant 0 : i32
    return %arg0, %arg1, %arg2 : i32, i32, i32
  }
}

</mosaic_0001>

<bundles_post_ra>
// kernel: tpu_custom_call.1
= control target key start
LH: loop header
LB: loop body
LE: loop exit
PB: predicated region body
PF: predicated region fallthrough
CT: control target
= control target key end

     0   :  { %7 = vsyncpa [#allocation3], 0  ;;  %s1830_s0 = inlined_call_operand.hbm [shape: bf16[2,256,256], index: 0, kind: input, shape index: {}]   ;;  %s1831_s1 = inlined_call_operand.hbm [shape: bf16[2,256,128], index: 1, kind: input, shape index: {}]   ;;  %s1832_s2 = inlined_call_operand.hbm [shape: f32[2,256,128], index: 2, kind: output, shape index: {}]  }
   0x1   :  { %9 = vsyncpa [#allocation3 + $0x1], 0 }
   0x2   :  { %10 = vsyncpa [#allocation6], 0 }
   0x3   :  { %12 = vsyncpa [#allocation6 + $0x1], 0 }
   0x4   :  { %13 = vsyncpa [#allocation4], 0 }
   0x5   :  { %15 = vsyncpa [#allocation4 + $0x1], 0  ;;  %s1514_s9 = smov 0   ;;  %s1516_s10 = smov 0  }
   0x6   :  { %s1518_s11 = smov 0   ;;  %s1520_s12 = smov 0  }
   0x7   :  { %s1522_s13 = smov 0   ;;  %s1524_s14 = smov 0  }
   0x8 LB: > { %s1006_s15 = sadd.s32 4294967295, %s1488_s14   ;;  %s1007_s16 = sadd.s32 4294967294, %s1488_s14   ;;  %s1488_s14 = sphi %s1524_s14, %s21_s14   ;;  %s1484_s13 = sphi %s1522_s13, %s1850_s13   ;;  %s1480_s12 = sphi %s1520_s12, %s1849_s12   ;;  %s1476_s11 = sphi %s1518_s11, %s1848_s11   ;;  %s1472_s10 = sphi %s1516_s10, %s1847_s10   ;;  %s1468_s9 = sphi %s1514_s9, %s1846_s9  }
   0x9   : > { %s47_s17 = sadd.s32 1, %s1484_s13  ;;  %s58_s18 = sadd.s32 1, %s1476_s11 }
   0xa   : > { %p49_p0 = scmp.ge.s32.totalorder %s47_s17, 2  ;;  %p65_p1 = scmp.ne.s32.totalorder %s1476_s11, %s1472_s10 }
   0xb   : > { %p66_p2 = scmp.eq.s32.totalorder %s1488_s14, 0  ;;  %p71_p3 = scmp.ne.s32.totalorder %s1472_s10, %s1468_s9 }
   0xc   : > { %s1852_s17 = smov (%p49_p0, %s47_s17), 0  ;;  %p72_p5 = scmp.eq.s32.totalorder %s1006_s15, 0 }
   0xd   : > { %p1555_p4 = por %p66_p2, %p65_p1  ;;  %s51_s20 = ssub.s32 %s1484_s13, %s1852_s17 }
   0xe   : > { %p129_p6 = scmp.eq.s32.totalorder %s1006_s15, 1  ;;  %p56_p7 = scmp.eq.s32.totalorder %s51_s20, 0 }
   0xf   : > { %p1561_p8 = por %p72_p5, %p71_p3  ;;  %p135_p10 = scmp.eq.s32.totalorder %s1007_s16, 1 }
  0x10   : > { %p1565_p9 = por %p129_p6, %p65_p1  ;;  %p1221_p13 = scmp.lt.s32.totalorder %s1488_s14, 2 }
  0x11   : > { %s1836_s21 = scalar_select %p1561_p8, 1, 0 }
  0x12   : > { %s1837_s22 = scalar_select %p1565_p9, 1, 0 }
  0x13   : > { %s1570_s23 = scalar_select %p56_p7, %s1476_s11, %s58_s18  }
  0x14   : > { %p1572_p11 = por %p135_p10, %p71_p3  ;;  %s1579_s25 = sand.u32 1, %s1476_s11  }
  0x15   : > { %s1010_s26 = sshll.u32 %s1579_s25, 8  ;;  %s1073_s27 = sshll.u32 %s1484_s13, 12 }
  0x16   : > { %s1838_s24 = scalar_select %p1572_p11, 1, 0 }
  0x17   : > { %s1586_s30 = scalar_lea.hbm %s1830_s0, %s1073_s27  ;;  %s159_s3 = scalar_lea.vmem [#allocation2], %s1010_s26 }
  0x18   : > { %s171_s4 = sshll.u32 %s159_s3, 4  ;;  %p1592_p0 = pnand %p1221_p13, %p1555_p4  ;;  %s1588_s4 = int_to_ptr.vmem [resolvable:$true] %s171_s4 }
  0x19   : > { %s156_s6 = scalar_lea.sflag [#allocation3], %s1579_s25  ;;  %s1342_s7 = scalar_lea.hbm %s1586_s30, 4096 }
  0x1a   : > { %p1343_p2 = scmp.ne.s32.totalorder %s1586_s30, %s1342_s7  ;;  %p1344_p3 = pneg %p1592_p0 }
  0x1b   : > { %s1347_s16 = scalar_lea.hbm %s1830_s0, 8192  ;;  %p1348_p4 = scmp.lt.u32.totalorder %s1586_s30, %s1830_s0 }
  0x1c   : > { %p1345_p5 = pnand %p1344_p3, %p1343_p2  ;;  %p1349_p7 = scmp.lt.u32.totalorder %s1347_s16, %s1342_s7 }
  0x1d   : > { %p1351_p13 = scmp.lt.u32.totalorder %s1342_s7, %s1586_s30 }
  0x1e   : > { %p1346_p6 = pneg %p1345_p5  ;;  %p1350_p10 = por %p1349_p7, %p1348_p4 }
  0x20   : > { %p1352_p12 = por %p1351_p13, %p1350_p10 }
  0x22   : > { %p1353_p1 = pnand %p1352_p12, %p1346_p6 }
  0x24   : > { %1356 = shalt.err (!%p1353_p1)
}
  0x25   : > { %s1357_s20 = scalar_lea.vmem %s1588_s4, 4096  ;;  %s1490_s26 = smov [#allocation2]  }
  0x26   : > { %p1358_p2 = scmp.ne.s32.totalorder %s1588_s4, %s1357_s20  ;;  %s1362_s27 = sshll.u32 %s1490_s26, 4  ;;  %s1363_s27 = int_to_ptr.vmem [resolvable:$false] %s1362_s27 }
  0x27   : > { %s1364_s28 = scalar_lea.vmem %s1363_s27, 8192  ;;  %p1365_p9 = scmp.lt.s32.totalorder %s1588_s4, %s1363_s27 }
  0x28   : > { %p1360_p5 = pnand %p1358_p2, %p1344_p3  ;;  %p1366_p4 = scmp.lt.s32.totalorder %s1364_s28, %s1357_s20 }
  0x2a   : > { %p1361_p11 = pneg %p1360_p5  ;;  %p1367_p7 = por %p1366_p4, %p1365_p9 }
  0x2c   : > { %p1368_p10 = pnand %p1367_p7, %p1361_p11 }
  0x2e   : > { %1371 = shalt.err (!%p1368_p10)
}
  0x2f   : > { %s1491_s29 = smov 128   ;;  %s1492_s3 = smov 8  }
  0x30   : > { %1213 = dma.hbm_to_vmem [thread:$0]  (!%p1592_p0), %s1586_s30, 4096, %s1588_s4, %s156_s6, %s1491_s29, %s1491_s29, %s1492_s3  }
  0x31   : > { %p203_p12 = scmp.lt.s32.totalorder %s1488_s14, 3  ;;  %s1013_s7 = sshll.u32 %s1579_s25, 7 }
  0x32   : > { %s1074_s8 = sshll.u32 %s1484_s13, 11  ;;  %p1840_p9 = scmp.ge.s32.totalorder %s1488_s14, 1 }
  0x33   : > { %s1637_s19 = scalar_lea.hbm %s1831_s1, %s1074_s8  ;;  %s185_s20 = scalar_lea.vmem [#allocation5], %s1013_s7 }
  0x34   : > { %p1630_p11 = pnand %p1840_p9, %p203_p12  ;;  %s195_s26 = sshll.u32 %s185_s20, 4  ;;  %s1639_s26 = int_to_ptr.vmem [resolvable:$true] %s195_s26 }
  0x35   : > { %s182_s30 = scalar_lea.sflag [#allocation6], %s1579_s25  ;;  %s1372_s4 = scalar_lea.hbm %s1637_s19, 2048 }
  0x36   : > { %p1373_p1 = scmp.ne.s32.totalorder %s1637_s19, %s1372_s4  ;;  %s1377_s28 = scalar_lea.hbm %s1831_s1, 4096 }
  0x37   : > { %p1378_p2 = scmp.lt.u32.totalorder %s1637_s19, %s1831_s1  ;;  %p1379_p5 = scmp.lt.u32.totalorder %s1377_s28, %s1372_s4 }
  0x38   : > { %p1375_p6 = pnand %p1373_p1, %p1344_p3  ;;  %p1381_p7 = scmp.lt.u32.totalorder %s1372_s4, %s1637_s19 }
  0x39   : > { %p1380_p4 = por %p1379_p5, %p1378_p2 }
  0x3a   : > { %p1376_p13 = pneg %p1375_p6 }
  0x3b   : > { %p1382_p10 = por %p1381_p7, %p1380_p4 }
  0x3d   : > { %p1383_p12 = pnand %p1382_p10, %p1376_p13 }
  0x3f   : > { %1386 = shalt.err (!%p1383_p12)
}
  0x40   : > { %s1387_s7 = scalar_lea.vmem %s1639_s26, 2048  ;;  %s1493_s8 = smov [#allocation5]  }
  0x41   : > { %p1388_p9 = scmp.ne.s32.totalorder %s1639_s26, %s1387_s7  ;;  %s1392_s16 = sshll.u32 %s1493_s8, 4  ;;  %s1393_s16 = int_to_ptr.vmem [resolvable:$false] %s1392_s16 }
  0x42   : > { %s1394_s18 = scalar_lea.vmem %s1393_s16, 4096  ;;  %p1395_p8 = scmp.lt.s32.totalorder %s1639_s26, %s1393_s16 }
  0x43   : > { %p1390_p1 = pnand %p1388_p9, %p1344_p3  ;;  %p1396_p2 = scmp.lt.s32.totalorder %s1394_s18, %s1387_s7 }
  0x45   : > { %p1391_p6 = pneg %p1390_p1  ;;  %p1397_p5 = por %p1396_p2, %p1395_p8 }
  0x47   : > { %p1398_p4 = pnand %p1397_p5, %p1391_p6 }
  0x49   : > { %1401 = shalt.err (!%p1398_p4)
}
  0x4a   : > { %s1494_s20 = smov 64   ;;  %s1495_s4 = smov 4  }
  0x4b   : > { %1216 = dma.hbm_to_vmem [thread:$0]  (!%p1592_p0), %s1637_s19, 2048, %s1639_s26, %s182_s30, %s1494_s20, %s1494_s20, %s1495_s4  }
  0x4c   : > { %207 = sbr.rel (%p1630_p11) target bundleno = 408 (0x198), region = 28  ;;  %s1670_s6 = sand.u32 (!%p1630_p11), 1, %s1472_s10  }
  0x4d   : > { %s1017_s27 = sshll.u32 (!%p1630_p11), %s1670_s6, 8  ;;  %s210_s28 = scalar_lea.sflag (!%p1630_p11), [#allocation3], %s1670_s6 }
  0x4e   : > { %s1676_s29 = scalar_lea.vmem (!%p1630_p11), [#allocation2], %s1017_s27  ;;  %p1842_p8 = scmp.ne.s32.totalorder (!%p1630_p11), %s1836_s21, 0 }
  0x53   : > { %1455 = dma.done.wait (%p1842_p8), %s210_s28, 4096  }
  0x54   : > { %1457 = vsyncadd (%p1842_p8), %s210_s28, 4294963200  ;;  %s1018_s25 = sshll.u32 %s1670_s6, 7  ;;  %s219_s5 = scalar_lea.sflag [#allocation6], %s1670_s6 }
  0x55   : > { %s1684_s15 = scalar_lea.vmem [#allocation5], %s1018_s25 }
  0x56   : > { %1459 = dma.done.wait (%p1842_p8), %s219_s5, 2048  }
  0x57   : > { %1461 = vsyncadd (%p1842_p8), %s219_s5, 4294965248  ;;  %v1278_v0 = vld [vmem:[%s1684_s15 + $0x40] sm:$0xff]   ;;  %v1280_v2 = vld [vmem:[%s1684_s15 + $0x48] sm:$0xff]   ;;  %s1740_s21 = scalar_lea.vmem [#allocation7], %s1017_s27  ;;  %s1075_s19 = sshll.u32 %s1480_s12, 12 }
  0x58   : > { %v1279_v1 = vld [vmem:[%s1684_s15] sm:$0xff]   ;;  %1076 = vmatprep.subr.bf16.mxu0 %v1278_v0  ;;  %1188 = vmatprep.subr.bf16.mxu1 %v1278_v0  ;;  %v1281_v3 = vld [vmem:[%s1684_s15 + $0x8] sm:$0xff]   ;;  %v1282_v4 = vld [vmem:[%s1684_s15 + $0x50] sm:$0xff]   ;;  %s883_s26 = sshll.u32 %s1740_s21, 4  ;;  %s1775_s7 = scalar_lea.hbm %s1832_s2, %s1075_s19  ;;  %s1777_s26 = int_to_ptr.vmem [resolvable:$true] %s883_s26 }
  0x59   : > { %1077 = vmatpush3.bf16.msra.mxu0 %v1279_v1  ;;  %1196 = vmatpush3.bf16.msra.mxu1 %v1279_v1  ;;  %v1283_v5 = vld [vmem:[%s1684_s15 + $0x10] sm:$0xff]   ;;  %v1284_v6 = vld [vmem:[%s1684_s15 + $0x58] sm:$0xff]   ;;  %v1286_v8 = vld [vmem:[%s1684_s15 + $0x60] sm:$0xff]   ;;  %s867_s12 = scalar_lea.sflag [#allocation4], %s1670_s6  ;;  %s1402_s8 = scalar_lea.vmem %s1777_s26, 4096 }
  0x5a   : > { %1078 = vmatprep.subr.bf16.mxu0 %v1280_v2  ;;  %1189 = vmatprep.subr.bf16.mxu1 %v1280_v2  ;;  %v1285_v7 = vld [vmem:[%s1684_s15 + $0x18] sm:$0xff]   ;;  %v1287_v9 = vld [vmem:[%s1684_s15 + $0x20] sm:$0xff]   ;;  %v1288_v10 = vld [vmem:[%s1684_s15 + $0x68] sm:$0xff]   ;;  %p1403_p0 = scmp.ne.s32.totalorder %s1777_s26, %s1402_s8  ;;  %p1843_p3 = scmp.ne.s32.totalorder %s1837_s22, 0 }
  0x5b   : > { %v1296_v11 = vld [vmem:[%s1676_s29 + $0x4] ss:$8 sps:$4 sm:$0xff]   ;;  %v1290_v14 = vld [vmem:[%s1684_s15 + $0x70] sm:$0xff]   ;;  %v1292_v16 = vld [vmem:[%s1684_s15 + $0x78] sm:$0xff]   ;;  %s1496_s16 = smov [#allocation7]  }
  0x5c   : > { %v1299_v12 = vld [vmem:[%s1676_s29 + $0x84] ss:$8 sps:$4 sm:$0xff]   ;;  %673 = vmatprep.mubr.bf16.mxu0 %v1296_v11  ;;  %v1291_v15 = vld [vmem:[%s1684_s15 + $0x30] sm:$0xff]   ;;  %v1293_v17 = vld [vmem:[%s1684_s15 + $0x38] sm:$0xff]   ;;  %p1404_p11 = pnand %p1403_p0, %p1843_p3  ;;  %s1406_s18 = sshll.u32 %s1496_s16, 4  ;;  %s1407_s18 = int_to_ptr.vmem [resolvable:$false] %s1406_s18 }
  0x5d   : > { %1079 = vmatpush3.bf16.msra.mxu0 %v1281_v3  ;;  %1197 = vmatpush3.bf16.msra.mxu1 %v1281_v3  ;;  %v1289_v13 = vld [vmem:[%s1684_s15 + $0x28] sm:$0xff]   ;;  %v1300_v20 = vld [vmem:[%s1676_s29 + $0x14] ss:$8 sps:$4 sm:$0xff]   ;;  %v1304_v22 = vld [vmem:[%s1676_s29 + $0x10] ss:$8 sps:$4 sm:$0xff]   ;;  %s1408_s20 = scalar_lea.vmem %s1407_s18, 8192  ;;  %p1409_p7 = scmp.lt.s32.totalorder %s1777_s26, %s1407_s18 }
  0x5e   : > { %1080 = vmatprep.subr.bf16.mxu0 %v1282_v4  ;;  %1190 = vmatprep.subr.bf16.mxu1 %v1282_v4  ;;  %v1294_v18 = vld [vmem:[%s1676_s29] ss:$8 sps:$4 sm:$0xff]   ;;  %v1302_v21 = vld [vmem:[%s1676_s29 + $0x94] ss:$8 sps:$4 sm:$0xff]   ;;  %v1305_v23 = vld [vmem:[%s1676_s29 + $0x90] ss:$8 sps:$4 sm:$0xff]   ;;  %p1405_p13 = pneg %p1404_p11  ;;  %p1410_p10 = scmp.lt.s32.totalorder %s1408_s20, %s1402_s8 }
  0x5f   : > { %737 = vmatprep.mubr.bf16.mxu1 %v1299_v12  ;;  %v1297_v19 = vld [vmem:[%s1676_s29 + $0x80] ss:$8 sps:$4 sm:$0xff]   ;;  %v1306_v24 = vld [vmem:[%s1676_s29 + $0x24] ss:$8 sps:$4 sm:$0xff]   ;;  %v1312_v28 = vld [vmem:[%s1676_s29 + $0x34] ss:$8 sps:$4 sm:$0xff]  }
  0x60   : > { %v1308_v25 = vld [vmem:[%s1676_s29 + $0xa4] ss:$8 sps:$4 sm:$0xff]   ;;  %v1310_v26 = vld [vmem:[%s1676_s29 + $0x20] ss:$8 sps:$4 sm:$0xff]   ;;  %v1314_v29 = vld [vmem:[%s1676_s29 + $0xb4] ss:$8 sps:$4 sm:$0xff]   ;;  %p1411_p12 = por %p1410_p10, %p1409_p7 }
  0x61   : > { %1081 = vmatpush3.bf16.msra.mxu0 %v1283_v5  ;;  %1198 = vmatpush3.bf16.msra.mxu1 %v1283_v5  ;;  %v1311_v27 = vld [vmem:[%s1676_s29 + $0xa0] ss:$8 sps:$4 sm:$0xff]   ;;  %v1316_v30 = vld [vmem:[%s1676_s29 + $0x30] ss:$8 sps:$4 sm:$0xff]   ;;  %v1318_v32 = vld [vmem:[%s1676_s29 + $0x44] ss:$8 sps:$4 sm:$0xff]  }
  0x62   : > { %1082 = vmatprep.subr.bf16.mxu0 %v1284_v6  ;;  %1191 = vmatprep.subr.bf16.mxu1 %v1284_v6  ;;  %v1317_v31 = vld [vmem:[%s1676_s29 + $0xb0] ss:$8 sps:$4 sm:$0xff]   ;;  %v1320_v33 = vld [vmem:[%s1676_s29 + $0xc4] ss:$8 sps:$4 sm:$0xff]   ;;  %v1322_v34 = vld [vmem:[%s1676_s29 + $0x40] ss:$8 sps:$4 sm:$0xff]   ;;  %p1412_p9 = pnand %p1411_p12, %p1405_p13 }
  0x63   : > { %v1323_v35 = vld [vmem:[%s1676_s29 + $0xc0] ss:$8 sps:$4 sm:$0xff]   ;;  %v1324_v36 = vld [vmem:[%s1676_s29 + $0x54] ss:$8 sps:$4 sm:$0xff]   ;;  %v1328_v38 = vld [vmem:[%s1676_s29 + $0x50] ss:$8 sps:$4 sm:$0xff]  }
  0x64   : > { %v1326_v37 = vld [vmem:[%s1676_s29 + $0xd4] ss:$8 sps:$4 sm:$0xff]   ;;  %v1329_v39 = vld [vmem:[%s1676_s29 + $0xd0] ss:$8 sps:$4 sm:$0xff]   ;;  %v1330_v40 = vld [vmem:[%s1676_s29 + $0x64] ss:$8 sps:$4 sm:$0xff]  }
  0x65   : > { %1083 = vmatpush3.bf16.msra.mxu0 %v1285_v7  ;;  %1199 = vmatpush3.bf16.msra.mxu1 %v1285_v7  ;;  %v1332_v41 = vld [vmem:[%s1676_s29 + $0xe4] ss:$8 sps:$4 sm:$0xff]   ;;  %v1334_v42 = vld [vmem:[%s1676_s29 + $0x60] ss:$8 sps:$4 sm:$0xff]   ;;  %v1336_v44 = vld [vmem:[%s1676_s29 + $0x74] ss:$8 sps:$4 sm:$0xff]  }
  0x66   : > { %1084 = vmatprep.subr.bf16.mxu0 %v1286_v8  ;;  %1192 = vmatprep.subr.bf16.mxu1 %v1286_v8  ;;  %v1335_v43 = vld [vmem:[%s1676_s29 + $0xe0] ss:$8 sps:$4 sm:$0xff]   ;;  %v1338_v45 = vld [vmem:[%s1676_s29 + $0xf4] ss:$8 sps:$4 sm:$0xff]   ;;  %v1340_v46 = vld [vmem:[%s1676_s29 + $0x70] ss:$8 sps:$4 sm:$0xff]  }
  0x67   : > { %v1341_v47 = vld [vmem:[%s1676_s29 + $0xf0] ss:$8 sps:$4 sm:$0xff]  }
  0x69   : > { %1085 = vmatpush3.bf16.msra.mxu0 %v1287_v9  ;;  %1200 = vmatpush3.bf16.msra.mxu1 %v1287_v9 }
  0x6a   : > { %1086 = vmatprep.subr.bf16.mxu0 %v1288_v10  ;;  %1193 = vmatprep.subr.bf16.mxu1 %v1288_v10 }
  0x6d   : > { %1087 = vmatpush3.bf16.msra.mxu0 %v1289_v13  ;;  %1201 = vmatpush3.bf16.msra.mxu1 %v1289_v13 }
  0x6e   : > { %1088 = vmatprep.subr.bf16.mxu0 %v1290_v14  ;;  %1194 = vmatprep.subr.bf16.mxu1 %v1290_v14 }
  0x71   : > { %1089 = vmatpush3.bf16.msra.mxu0 %v1291_v15  ;;  %1202 = vmatpush3.bf16.msra.mxu1 %v1291_v15 }
  0x72   : > { %1090 = vmatprep.subr.bf16.mxu0 %v1292_v16  ;;  %1195 = vmatprep.subr.bf16.mxu1 %v1292_v16 }
  0x75   : > { %1091 = vmatpush3.bf16.msra.mxu0 %v1293_v17  ;;  %1203 = vmatpush3.bf16.msra.mxu1 %v1293_v17 }
  0x78   : > { %674 = vmatmul.mubr.bf16.vlgmr.msra.gmra.mrb[0].mxu0 %v1294_v18  ;;  %738 = vmatmul.mubr.bf16.vlgmr.msra.gmra.mrb[0].mxu1 %v1297_v19 }
  0x79   : > { %681 = vmatprep.mubr.bf16.mxu0 %v1300_v20  ;;  %745 = vmatprep.mubr.bf16.mxu1 %v1302_v21 }
  0x80   : > { %682 = vmatmul.mubr.bf16.gmra.mrb[4].mxu0 %v1304_v22  ;;  %746 = vmatmul.mubr.bf16.gmra.mrb[4].mxu1 %v1305_v23 }
  0x81   : > { %689 = vmatprep.mubr.bf16.mxu0 %v1306_v24  ;;  %753 = vmatprep.mubr.bf16.mxu1 %v1308_v25 }
  0x88   : > { %690 = vmatmul.mubr.bf16.gmra.mrb[8].mxu0 %v1310_v26  ;;  %754 = vmatmul.mubr.bf16.gmra.mrb[8].mxu1 %v1311_v27 }
  0x89   : > { %697 = vmatprep.mubr.bf16.mxu0 %v1312_v28  ;;  %761 = vmatprep.mubr.bf16.mxu1 %v1314_v29 }
  0x90   : > { %698 = vmatmul.mubr.bf16.gmra.mrb[12].mxu0 %v1316_v30  ;;  %762 = vmatmul.mubr.bf16.gmra.mrb[12].mxu1 %v1317_v31 }
  0x91   : > { %705 = vmatprep.mubr.bf16.mxu0 %v1318_v32  ;;  %769 = vmatprep.mubr.bf16.mxu1 %v1320_v33 }
  0x98   : > { %706 = vmatmul.mubr.bf16.gmra.mrb[16].mxu0 %v1322_v34  ;;  %770 = vmatmul.mubr.bf16.gmra.mrb[16].mxu1 %v1323_v35 }
  0x99   : > { %713 = vmatprep.mubr.bf16.mxu0 %v1324_v36  ;;  %777 = vmatprep.mubr.bf16.mxu1 %v1326_v37 }
  0xa0   : > { %714 = vmatmul.mubr.bf16.gmra.mrb[20].mxu0 %v1328_v38  ;;  %778 = vmatmul.mubr.bf16.gmra.mrb[20].mxu1 %v1329_v39 }
  0xa1   : > { %721 = vmatprep.mubr.bf16.mxu0 %v1330_v40  ;;  %785 = vmatprep.mubr.bf16.mxu1 %v1332_v41 }
  0xa8   : > { %722 = vmatmul.mubr.bf16.gmra.mrb[24].mxu0 %v1334_v42  ;;  %786 = vmatmul.mubr.bf16.gmra.mrb[24].mxu1 %v1335_v43 }
  0xa9   : > { %729 = vmatprep.mubr.bf16.mxu0 %v1336_v44  ;;  %793 = vmatprep.mubr.bf16.mxu1 %v1338_v45 }
  0xb0   : > { %730 = vmatmul.mubr.bf16.gmra.mrb[28].mxu0 %v1340_v46  ;;  %794 = vmatmul.mubr.bf16.gmra.mrb[28].mxu1 %v1341_v47 }
 0x14b   : > { %v1092_v48 = vpop.f32.mrb[0].mxu0  ;;  %v1140_v49 = vpop.f32.mrb[0].mxu1 }
 0x14c   : > { %v1093_v50 = vpop.f32.mrb[1].mxu0  ;;  %v1141_v51 = vpop.f32.mrb[1].mxu1 }
 0x14d   : > { %v1094_v52 = vadd.f32 %v1093_v50, %v1092_v48  ;;  %v1142_v53 = vadd.f32 %v1141_v51, %v1140_v49  ;;  %v1095_v54 = vpop.f32.mrb[2].mxu0  ;;  %v1143_v55 = vpop.f32.mrb[2].mxu1 }
 0x14e   : > { %v1096_v56 = vpop.f32.mrb[3].mxu0  ;;  %v1144_v57 = vpop.f32.mrb[3].mxu1 }
 0x14f   : > { %v1097_v58 = vadd.f32 %v1096_v56, %v1095_v54  ;;  %v1145_v59 = vadd.f32 %v1144_v57, %v1143_v55  ;;  %834 = vst [vmem:[%s1740_s21] sm:$0xff] %v1094_v52  ;;  %850 = vst [vmem:[%s1740_s21 + $0x80] sm:$0xff] %v1142_v53 }
 0x151   : > { %835 = vst [vmem:[%s1740_s21 + $0x8] sm:$0xff] %v1097_v58  ;;  %851 = vst [vmem:[%s1740_s21 + $0x88] sm:$0xff] %v1145_v59 }
 0x153   : > { %v1098_v60 = vpop.f32.mrb[4].mxu0  ;;  %v1146_v61 = vpop.f32.mrb[4].mxu1 }
 0x154   : > { %v1099_v62 = vpop.f32.mrb[5].mxu0  ;;  %v1147_v63 = vpop.f32.mrb[5].mxu1 }
 0x155   : > { %v1100_v0 = vadd.f32 %v1099_v62, %v1098_v60  ;;  %v1148_v1 = vadd.f32 %v1147_v63, %v1146_v61  ;;  %v1101_v2 = vpop.f32.mrb[6].mxu0  ;;  %v1149_v3 = vpop.f32.mrb[6].mxu1 }
 0x156   : > { %v1102_v4 = vpop.f32.mrb[7].mxu0  ;;  %v1150_v5 = vpop.f32.mrb[7].mxu1 }
 0x157   : > { %v1103_v6 = vadd.f32 %v1102_v4, %v1101_v2  ;;  %v1151_v7 = vadd.f32 %v1150_v5, %v1149_v3  ;;  %836 = vst [vmem:[%s1740_s21 + $0x10] sm:$0xff] %v1100_v0  ;;  %852 = vst [vmem:[%s1740_s21 + $0x90] sm:$0xff] %v1148_v1 }
 0x159   : > { %837 = vst [vmem:[%s1740_s21 + $0x18] sm:$0xff] %v1103_v6  ;;  %853 = vst [vmem:[%s1740_s21 + $0x98] sm:$0xff] %v1151_v7 }
 0x15b   : > { %v1104_v8 = vpop.f32.mrb[8].mxu0  ;;  %v1152_v9 = vpop.f32.mrb[8].mxu1 }
 0x15c   : > { %v1105_v10 = vpop.f32.mrb[9].mxu0  ;;  %v1153_v11 = vpop.f32.mrb[9].mxu1 }
 0x15d   : > { %v1106_v12 = vadd.f32 %v1105_v10, %v1104_v8  ;;  %v1154_v13 = vadd.f32 %v1153_v11, %v1152_v9  ;;  %v1107_v14 = vpop.f32.mrb[10].mxu0  ;;  %v1155_v15 = vpop.f32.mrb[10].mxu1 }
 0x15e   : > { %v1108_v16 = vpop.f32.mrb[11].mxu0  ;;  %v1156_v17 = vpop.f32.mrb[11].mxu1 }
 0x15f   : > { %v1109_v18 = vadd.f32 %v1108_v16, %v1107_v14  ;;  %v1157_v19 = vadd.f32 %v1156_v17, %v1155_v15  ;;  %838 = vst [vmem:[%s1740_s21 + $0x20] sm:$0xff] %v1106_v12  ;;  %854 = vst [vmem:[%s1740_s21 + $0xa0] sm:$0xff] %v1154_v13 }
 0x161   : > { %839 = vst [vmem:[%s1740_s21 + $0x28] sm:$0xff] %v1109_v18  ;;  %855 = vst [vmem:[%s1740_s21 + $0xa8] sm:$0xff] %v1157_v19 }
 0x163   : > { %v1110_v20 = vpop.f32.mrb[12].mxu0  ;;  %v1158_v21 = vpop.f32.mrb[12].mxu1 }
 0x164   : > { %v1111_v22 = vpop.f32.mrb[13].mxu0  ;;  %v1159_v23 = vpop.f32.mrb[13].mxu1 }
 0x165   : > { %v1112_v24 = vadd.f32 %v1111_v22, %v1110_v20  ;;  %v1160_v25 = vadd.f32 %v1159_v23, %v1158_v21  ;;  %v1113_v26 = vpop.f32.mrb[14].mxu0  ;;  %v1161_v27 = vpop.f32.mrb[14].mxu1 }
 0x166   : > { %v1114_v28 = vpop.f32.mrb[15].mxu0  ;;  %v1162_v29 = vpop.f32.mrb[15].mxu1 }
 0x167   : > { %v1115_v30 = vadd.f32 %v1114_v28, %v1113_v26  ;;  %v1163_v31 = vadd.f32 %v1162_v29, %v1161_v27  ;;  %840 = vst [vmem:[%s1740_s21 + $0x30] sm:$0xff] %v1112_v24  ;;  %856 = vst [vmem:[%s1740_s21 + $0xb0] sm:$0xff] %v1160_v25 }
 0x169   : > { %841 = vst [vmem:[%s1740_s21 + $0x38] sm:$0xff] %v1115_v30  ;;  %857 = vst [vmem:[%s1740_s21 + $0xb8] sm:$0xff] %v1163_v31 }
 0x16b   : > { %v1116_v32 = vpop.f32.mrb[16].mxu0  ;;  %v1164_v33 = vpop.f32.mrb[16].mxu1 }
 0x16c   : > { %v1117_v34 = vpop.f32.mrb[17].mxu0  ;;  %v1165_v35 = vpop.f32.mrb[17].mxu1 }
 0x16d   : > { %v1118_v36 = vadd.f32 %v1117_v34, %v1116_v32  ;;  %v1166_v37 = vadd.f32 %v1165_v35, %v1164_v33  ;;  %v1119_v38 = vpop.f32.mrb[18].mxu0  ;;  %v1167_v39 = vpop.f32.mrb[18].mxu1 }
 0x16e   : > { %v1120_v40 = vpop.f32.mrb[19].mxu0  ;;  %v1168_v41 = vpop.f32.mrb[19].mxu1 }
 0x16f   : > { %v1121_v42 = vadd.f32 %v1120_v40, %v1119_v38  ;;  %v1169_v43 = vadd.f32 %v1168_v41, %v1167_v39  ;;  %842 = vst [vmem:[%s1740_s21 + $0x40] sm:$0xff] %v1118_v36  ;;  %858 = vst [vmem:[%s1740_s21 + $0xc0] sm:$0xff] %v1166_v37 }
 0x171   : > { %843 = vst [vmem:[%s1740_s21 + $0x48] sm:$0xff] %v1121_v42  ;;  %859 = vst [vmem:[%s1740_s21 + $0xc8] sm:$0xff] %v1169_v43 }
 0x173   : > { %v1122_v44 = vpop.f32.mrb[20].mxu0  ;;  %v1170_v45 = vpop.f32.mrb[20].mxu1 }
 0x174   : > { %v1123_v46 = vpop.f32.mrb[21].mxu0  ;;  %v1171_v47 = vpop.f32.mrb[21].mxu1 }
 0x175   : > { %v1124_v48 = vadd.f32 %v1123_v46, %v1122_v44  ;;  %v1172_v49 = vadd.f32 %v1171_v47, %v1170_v45  ;;  %v1125_v50 = vpop.f32.mrb[22].mxu0  ;;  %v1173_v51 = vpop.f32.mrb[22].mxu1 }
 0x176   : > { %v1126_v52 = vpop.f32.mrb[23].mxu0  ;;  %v1174_v53 = vpop.f32.mrb[23].mxu1 }
 0x177   : > { %v1127_v54 = vadd.f32 %v1126_v52, %v1125_v50  ;;  %v1175_v55 = vadd.f32 %v1174_v53, %v1173_v51  ;;  %844 = vst [vmem:[%s1740_s21 + $0x50] sm:$0xff] %v1124_v48  ;;  %860 = vst [vmem:[%s1740_s21 + $0xd0] sm:$0xff] %v1172_v49 }
 0x179   : > { %845 = vst [vmem:[%s1740_s21 + $0x58] sm:$0xff] %v1127_v54  ;;  %861 = vst [vmem:[%s1740_s21 + $0xd8] sm:$0xff] %v1175_v55 }
 0x17b   : > { %v1128_v56 = vpop.f32.mrb[24].mxu0  ;;  %v1176_v57 = vpop.f32.mrb[24].mxu1 }
 0x17c   : > { %v1129_v58 = vpop.f32.mrb[25].mxu0  ;;  %v1177_v59 = vpop.f32.mrb[25].mxu1 }
 0x17d   : > { %v1130_v60 = vadd.f32 %v1129_v58, %v1128_v56  ;;  %v1178_v61 = vadd.f32 %v1177_v59, %v1176_v57  ;;  %v1131_v62 = vpop.f32.mrb[26].mxu0  ;;  %v1179_v63 = vpop.f32.mrb[26].mxu1 }
 0x17e   : > { %v1132_v0 = vpop.f32.mrb[27].mxu0  ;;  %v1180_v1 = vpop.f32.mrb[27].mxu1 }
 0x17f   : > { %v1133_v2 = vadd.f32 %v1132_v0, %v1131_v62  ;;  %v1181_v3 = vadd.f32 %v1180_v1, %v1179_v63  ;;  %846 = vst [vmem:[%s1740_s21 + $0x60] sm:$0xff] %v1130_v60  ;;  %862 = vst [vmem:[%s1740_s21 + $0xe0] sm:$0xff] %v1178_v61 }
 0x181   : > { %847 = vst [vmem:[%s1740_s21 + $0x68] sm:$0xff] %v1133_v2  ;;  %863 = vst [vmem:[%s1740_s21 + $0xe8] sm:$0xff] %v1181_v3 }
 0x183   : > { %v1134_v4 = vpop.f32.mrb[28].mxu0  ;;  %v1182_v5 = vpop.f32.mrb[28].mxu1 }
 0x184   : > { %v1135_v6 = vpop.f32.mrb[29].mxu0  ;;  %v1183_v7 = vpop.f32.mrb[29].mxu1 }
 0x185   : > { %v1136_v8 = vadd.f32 %v1135_v6, %v1134_v4  ;;  %v1184_v9 = vadd.f32 %v1183_v7, %v1182_v5  ;;  %v1137_v10 = vpop.f32.mrb[30].mxu0  ;;  %v1185_v11 = vpop.f32.mrb[30].mxu1 }
 0x186   : > { %v1138_v12 = vpop.f32.mrb[31].mxu0  ;;  %v1186_v13 = vpop.f32.mrb[31].mxu1 }
 0x187   : > { %v1139_v14 = vadd.f32 %v1138_v12, %v1137_v10  ;;  %v1187_v15 = vadd.f32 %v1186_v13, %v1185_v11  ;;  %848 = vst [vmem:[%s1740_s21 + $0x70] sm:$0xff] %v1136_v8  ;;  %864 = vst [vmem:[%s1740_s21 + $0xf0] sm:$0xff] %v1184_v9 }
 0x189   : > { %849 = vst [vmem:[%s1740_s21 + $0x78] sm:$0xff] %v1139_v14  ;;  %865 = vst [vmem:[%s1740_s21 + $0xf8] sm:$0xff] %v1187_v15 }
 0x18a   : > { %1415 = shalt.err (!%p1412_p9)
}
 0x18b   : > { %s1416_s4 = scalar_lea.hbm %s1775_s7, 4096  ;;  %s1420_s29 = scalar_lea.hbm %s1832_s2, 8192 }
 0x18c   : > { %p1417_p1 = scmp.ne.s32.totalorder %s1775_s7, %s1416_s4  ;;  %p1421_p5 = scmp.lt.u32.totalorder %s1775_s7, %s1832_s2 }
 0x18d   : > { %p1422_p4 = scmp.lt.u32.totalorder %s1420_s29, %s1416_s4  ;;  %p1424_p0 = scmp.lt.u32.totalorder %s1416_s4, %s1775_s7 }
 0x18e   : > { %p1418_p6 = pnand %p1417_p1, %p1843_p3 }
 0x18f   : > { %p1423_p8 = por %p1422_p4, %p1421_p5 }
 0x190   : > { %p1419_p2 = pneg %p1418_p6 }
 0x191   : > { %p1425_p11 = por %p1424_p0, %p1423_p8 }
 0x193   : > { %p1426_p13 = pnand %p1425_p11, %p1419_p2 }
 0x195   : > { %1429 = shalt.err (!%p1426_p13)
}
 0x196   : > { %s1497_s15 = smov 128   ;;  %s1498_s21 = smov 8  }
 0x197   : > { %1208 = dma.vmem_to_hbm [thread:$0]  (%p1843_p3), %s1777_s26, 4096, %s1775_s7, %s867_s12, %s1497_s15, %s1497_s15, %s1498_s21  }
 0x198 PF: > { %s898_s19 = sand.u32 1, %s1468_s9   ;;  %p1844_p7 = scmp.ne.s32.totalorder %s1838_s24, 0 }
 0x199   : > { %p1845_p10 = scmp.ge.s32.totalorder %s1488_s14, 2  ;;  %s899_s30 = scalar_lea.sflag [#allocation4], %s898_s19 }
 0x19b   : > { %p1218_p12 = pnand %p1845_p10, %p1844_p7 }
 0x19d   : > { %1463 = dma.done.wait (!%p1218_p12), %s899_s30, 4096  }
 0x19e   : > { %1465 = vsyncadd (!%p1218_p12), %s899_s30, 4294963200  ;;  %s21_s14 = sadd.s32 1, %s1488_s14   ;;  %s1846_s9 = smov %s1472_s10 }
 0x19f   : > { %p18_p9 = scmp.ge.s32.totalorder %s21_s14, 4   ;;  %s1847_s10 = smov %s1476_s11 }
 0x1a0   : > { %s1848_s11 = smov %s1570_s23  ;;  %s1849_s12 = smov %s1484_s13 }
 0x1a1   : > { %s1850_s13 = smov %s1852_s17  ;;  %20 = sbr.rel (!%p18_p9) target bundleno = 8 (0x8), region = 90 }
 0x1a8   :  { %904 = vsyncpa [#allocation3], 1 }
 0x1a9   :  { %906 = vsyncpa [#allocation3 + $0x1], 1 }
 0x1aa   :  { %907 = vsyncpa [#allocation6], 1 }
 0x1ab   :  { %909 = vsyncpa [#allocation6 + $0x1], 1 }
 0x1ac   :  { %910 = vsyncpa [#allocation4], 1 }
 0x1ad   :  { %912 = vsyncpa [#allocation4 + $0x1], 1 }

</bundles_post_ra>
